<compile_context>
chip_gen: v5e
topology: v5e:2x2
jax: 0.10.0
libtpu: 0.0.40
codegen_flags: <defaults>
</compile_context>

<pallas_src>
import functools

import jax
import jax.numpy as jnp
from jax.experimental import pallas as pl
from jax.experimental.pallas import tpu as pltpu

ALPHA = 0.25      # focal alpha
GAMMA = 2.0       # focal gamma
assert GAMMA == 2.0, "kernel specializes (1 - p_t)**gamma as q*q"
SMOOTH = 1.0      # dice smoothing
W_DICE = 0.7
W_FOCAL = 0.3

LANES = 128
SUBLANES = 8
TM_MAX = 2048     # rows per grid step; ~16-20 MiB live VMEM at f32, see vmem_limit_bytes


def _num_grid_splits():
    """2 only on dual-TensorCore chips (v7x); 1 on single-TC v5e/v6e."""
    try:
        kind = jax.devices()[0].device_kind.lower()
    except Exception:
        return 1
    return 2 if ("v7" in kind or "tpu7" in kind) else 1


def _row_granularity(dtype):
    """Minimum sublane multiple for a (rows, 128) tile of this dtype."""
    size = jnp.dtype(dtype).itemsize
    if size >= 4:
        return 8
    if size == 2:
        return 16
    return 32


def _combined_loss_kernel(pred_ref, target_ref, acc_ref, *, tm):
    i = pl.program_id(1)

    @pl.when(i == 0)
    def _init():
        acc_ref[...] = jnp.zeros_like(acc_ref)

    x = pred_ref[...].astype(jnp.float32)
    t = target_ref[...].astype(jnp.float32)

    # sigmoid(x) and numerically stable BCE-with-logits share one exp(-|x|).
    e = jnp.exp(-jnp.abs(x))
    den = 1.0 + e
    r = pl.reciprocal(den, approx=True)
    r = r * (2.0 - den * r)                       # one Newton step -> ~f32 accurate
    p = jnp.where(x >= 0.0, r, e * r)             # == sigmoid(x)
    bce = jnp.maximum(x, 0.0) - x * t + jnp.log1p(e)

    pt = p * t
    pp = p * p
    tt = t * t                                    # kept as t*t to stay exact for soft targets
    q = (p - pt) + (t - pt)                       # == 1 - p_t; p_t never materialized
    alpha_t = (1.0 - ALPHA) + (2.0 * ALPHA - 1.0) * t   # == ALPHA*t + (1-ALPHA)*(1-t)
    focal = alpha_t * (q * q) * bce               # gamma == 2.0 -> pow replaced by mul

    # Sublane fold on the otherwise idle MXU: ones(8, tm) @ v -> (8, 128);
    # every output row equals the per-lane column sum (wrapper divides by 8).
    ones = jnp.ones((SUBLANES, tm), jnp.float32)

    def fold(v):
        return jnp.dot(ones, v, preferred_element_type=jnp.float32)

    # Output block (1, 4, 8, 128) is the VMEM-resident accumulator; it is only
    # written back to HBM when the leading (split) index changes.
    acc_ref[0, 0] += fold(pt)      # sum(p * t)
    acc_ref[0, 1] += fold(pp)      # sum(p^2)   (squared=True dice denominator)
    acc_ref[0, 2] += fold(tt)      # sum(t^2)
    acc_ref[0, 3] += fold(focal)   # sum(focal terms)


def _partial_sums_f32(x, t):
    """Plain-JAX partial sums [sum(p*t), sum(p^2), sum(t^2), sum(focal)] for the tail."""
    x = x.astype(jnp.float32)
    t = t.astype(jnp.float32)
    p = jax.nn.sigmoid(x)
    bce = jnp.maximum(x, 0.0) - x * t + jnp.log1p(jnp.exp(-jnp.abs(x)))
    p_t = p * t + (1.0 - p) * (1.0 - t)
    alpha_t = ALPHA * t + (1.0 - ALPHA) * (1.0 - t)
    focal = alpha_t * (1.0 - p_t) ** 2 * bce
    return jnp.stack(
        [jnp.sum(p * t), jnp.sum(p * p), jnp.sum(t * t), jnp.sum(focal)]
    ).astype(jnp.float32)


def combined_loss(pred, target):
    """pred, target: arrays of identical shape (logits / targets). Returns a scalar f32 loss."""
    assert pred.shape == target.shape
    n = pred.size
    pred_flat = pred.reshape(-1)          # free bitcast for contiguous inputs
    target_flat = target.reshape(-1)

    m_raw = n // LANES                    # number of complete 128-lane rows
    gran = max(_row_granularity(pred.dtype), _row_granularity(target.dtype))

    if m_raw < gran:
        # Tiny input: nothing worth streaming; everything goes to the epilogue.
        kernel_sums = jnp.zeros((4,), jnp.float32)
        n_main = 0
    else:
        nsplit = _num_grid_splits()
        tm = min(TM_MAX, (m_raw // gran) * gran)
        steps = m_raw // (nsplit * tm)
        if steps == 0:                    # not enough rows to feed both cores
            nsplit = 1
            steps = m_raw // tm
        m_main = nsplit * steps * tm      # rows covered by the kernel
        n_main = m_main * LANES

        if n % LANES == 0:
            # Free reshape of the whole array; the grid simply never maps to
            # rows >= m_main (those go to the epilogue), so no copy and no mask.
            x2d = pred_flat.reshape(m_raw, LANES)
            t2d = target_flat.reshape(m_raw, LANES)
        else:
            # TODO(synk): a ragged element count still pays one O(n_main) slice
            # copy here; avoiding it entirely would need a manual-DMA 1-D kernel.
            x2d = pred_flat[:n_main].reshape(m_main, LANES)
            t2d = target_flat[:n_main].reshape(m_main, LANES)

        kernel = functools.partial(_combined_loss_kernel, tm=tm)

        def in_map(c, i):
            return (c * steps + i, 0)

        if nsplit > 1:
            # Dual-TC (v7x): shard the leading split across TensorCores.
            dim_sem = (pltpu.CORE_PARALLEL, pltpu.ARBITRARY)
        else:
            dim_sem = ("arbitrary", "arbitrary")

        partials = pl.pallas_call(
            kernel,
            out_shape=jax.ShapeDtypeStruct((nsplit, 4, SUBLANES, LANES), jnp.float32),
            grid_spec=pltpu.PrefetchScalarGridSpec(
                num_scalar_prefetch=0,
                grid=(nsplit, steps),
                in_specs=[
                    pl.BlockSpec((tm, LANES), in_map),
                    pl.BlockSpec((tm, LANES), in_map),
                ],
                out_specs=pl.BlockSpec(
                    (1, 4, SUBLANES, LANES), lambda c, i: (c, 0, 0, 0)
                ),
            ),
            compiler_params=pltpu.CompilerParams(
                dimension_semantics=dim_sem,
                vmem_limit_bytes=48 * 1024 * 1024,
            ),
        )(x2d, t2d)

        # Every sublane row of each (8,128) partial holds the same column sum.
        kernel_sums = jnp.sum(partials, axis=(0, 2, 3)) * (1.0 / SUBLANES)

    if n_main < n:
        # Small remainder (< nsplit*tm*128 + 128 elements): tail slice copies
        # only the tail, compute fuses into a few XLA ops.
        kernel_sums = kernel_sums + _partial_sums_f32(
            pred_flat[n_main:], target_flat[n_main:]
        )

    sum_pt = kernel_sums[0]
    sum_pp = kernel_sums[1]
    sum_tt = kernel_sums[2]
    sum_focal = kernel_sums[3]
    dice_loss = 1.0 - (2.0 * sum_pt + SMOOTH) / (sum_pp + sum_tt + SMOOTH)
    focal_loss = sum_focal / jnp.float32(n)
    return W_DICE * dice_loss + W_FOCAL * focal_loss


def _reference_loss(pred, target):
    """Pure-JAX reference of CombinedLoss([Dice(squared), Focal(0.25, 2.0)], [0.7, 0.3])."""
    x = pred.astype(jnp.float32).reshape(-1)
    t = target.astype(jnp.float32).reshape(-1)
    p = jax.nn.sigmoid(x)
    dice = 1.0 - (2.0 * jnp.sum(p * t) + SMOOTH) / (jnp.sum(p * p) + jnp.sum(t * t) + SMOOTH)
    bce = jnp.maximum(x, 0.0) - x * t + jnp.log1p(jnp.exp(-jnp.abs(x)))
    p_t = p * t + (1.0 - p) * (1.0 - t)
    alpha_t = ALPHA * t + (1.0 - ALPHA) * (1.0 - t)
    focal = jnp.mean(alpha_t * (1.0 - p_t) ** GAMMA * bce)
    return W_DICE * dice + W_FOCAL * focal


def _check(pred, target):
    loss = combined_loss(pred, target)
    jax.block_until_ready(loss)
    ref = _reference_loss(pred, target)
    assert jnp.allclose(loss, ref, rtol=1e-4, atol=1e-4), (loss, ref)


if __name__ == "__main__":
    key = jax.random.PRNGKey(0)
    ks = jax.random.split(key, 8)

    # Main check: NCHW logits + binary mask, 2048 elements (128-aligned, no copies).
    B, C, H, W = 2, 4, 16, 16
    pred = jax.random.normal(ks[0], (B, C, H, W), dtype=jnp.float32)               # logits
    target = (jax.random.uniform(ks[1], (B, C, H, W)) > 0.5).astype(jnp.float32)   # binary mask
    _check(pred, target)

    # 128-aligned with a row remainder (33 rows; kernel covers 32, 1 row in epilogue).
    pred_a = jax.random.normal(ks[2], (2, 3, 16, 44), dtype=jnp.float32)
    target_a = (jax.random.uniform(ks[3], (2, 3, 16, 44)) > 0.5).astype(jnp.float32)
    _check(pred_a, target_a)

    # Ragged element count (3162 = 24*128 + 90): kernel bulk + sub-128 JAX tail.
    pred_r = jax.random.normal(ks[4], (2, 3, 17, 31), dtype=jnp.float32)
    target_r = (jax.random.uniform(ks[5], (2, 3, 17, 31)) > 0.5).astype(jnp.float32)
    _check(pred_r, target_r)

    # Tiny input (462 elements): pure-JAX fallback path.
    pred_t = jax.random.normal(ks[6], (2, 3, 7, 11), dtype=jnp.float32)
    target_t = (jax.random.uniform(ks[7], (2, 3, 7, 11)) > 0.5).astype(jnp.float32)
    _check(pred_t, target_t)

    print("KERNEL_OK")
</pallas_src>

<mosaic_0001>
module attributes {stable_mosaic.version = 11 : i64} {
  func.func @_combined_loss_kernel(%arg0: i32, %arg1: i32, %arg2: memref<16x128xf32, #tpu.memory_space<vmem>>, %arg3: memref<16x128xf32, #tpu.memory_space<vmem>>, %arg4: memref<1x4x8x128xf32, #tpu.memory_space<vmem>>) attributes {dimension_semantics = [#tpu.dimension_semantics<arbitrary>, #tpu.dimension_semantics<arbitrary>], iteration_bounds = array<i64: 1, 1>, scalar_prefetch = 0 : i64, scratch_operands = 0 : i64, tpu.core_type = #tpu.core_type<tc>, window_params = [{transform_indices = @transform_0, window_bounds = array<i64: 16, 128>}, {transform_indices = @transform_1, window_bounds = array<i64: 16, 128>}, {transform_indices = @transform_2, window_bounds = array<i64: 1, 4, 8, 128>}]} {
    %c0_i32 = arith.constant 0 : i32
    %0 = arith.cmpi eq, %arg1, %c0_i32 : i32
    %1 = arith.extui %0 : i1 to i32
    %c0_i32_0 = arith.constant 0 : i32
    %2 = arith.cmpi ne, %1, %c0_i32_0 : i32
    scf.if %2 {
      %cst_44 = arith.constant 0.000000e+00 : f32
      %68 = vector.broadcast %cst_44 : f32 to vector<1x4x8x128xf32>
      %c0_45 = arith.constant 0 : index
      %c0_46 = arith.constant 0 : index
      %c0_47 = arith.constant 0 : index
      %c0_48 = arith.constant 0 : index
      %69 = vector.load %arg4[%c0_45, %c0_46, %c0_47, %c0_48] : memref<1x4x8x128xf32, #tpu.memory_space<vmem>>, vector<1x4x8x128xf32>
      tpu.vector_store %arg4[%c0_45, %c0_46, %c0_47, %c0_48], %68 {strides = array<i32>} : memref<1x4x8x128xf32, #tpu.memory_space<vmem>>, vector<1x4x8x128xf32>,
    } else {
    }
    %c0 = arith.constant 0 : index
    %c0_1 = arith.constant 0 : index
    %3 = vector.load %arg2[%c0, %c0_1] : memref<16x128xf32, #tpu.memory_space<vmem>>, vector<16x128xf32>
    %c0_2 = arith.constant 0 : index
    %c0_3 = arith.constant 0 : index
    %4 = vector.load %arg3[%c0_2, %c0_3] : memref<16x128xf32, #tpu.memory_space<vmem>>, vector<16x128xf32>
    %5 = math.absf %3 : vector<16x128xf32>
    %cst = arith.constant 0.000000e+00 : f32
    %6 = vector.broadcast %cst : f32 to vector<16x128xf32>
    %7 = arith.subf %6, %5 : vector<16x128xf32>
    %8 = math.exp %7 : vector<16x128xf32>
    %cst_4 = arith.constant 1.000000e+00 : f32
    %9 = vector.broadcast %cst_4 : f32 to vector<16x128xf32>
    %10 = arith.addf %9, %8 : vector<16x128xf32>
    %11 = tpu.reciprocal %10 {approx = true} : vector<16x128xf32> -> vector<16x128xf32>
    %12 = arith.mulf %10, %11 : vector<16x128xf32>
    %cst_5 = arith.constant 2.000000e+00 : f32
    %13 = vector.broadcast %cst_5 : f32 to vector<16x128xf32>
    %14 = arith.subf %13, %12 : vector<16x128xf32>
    %15 = arith.mulf %11, %14 : vector<16x128xf32>
    %cst_6 = arith.constant 0.000000e+00 : f32
    %16 = vector.broadcast %cst_6 : f32 to vector<16x128xf32>
    %17 = arith.cmpf oge, %3, %16 : vector<16x128xf32>
    %18 = arith.mulf %8, %15 : vector<16x128xf32>
    %19 = arith.select %17, %15, %18 : vector<16x128xi1>, vector<16x128xf32>
    %cst_7 = arith.constant 0.000000e+00 : f32
    %20 = vector.broadcast %cst_7 : f32 to vector<16x128xf32>
    %21 = arith.maximumf %3, %20 : vector<16x128xf32>
    %22 = arith.mulf %3, %4 : vector<16x128xf32>
    %23 = arith.subf %21, %22 : vector<16x128xf32>
    %24 = math.log1p %8 : vector<16x128xf32>
    %25 = arith.addf %23, %24 : vector<16x128xf32>
    %26 = arith.mulf %19, %4 : vector<16x128xf32>
    %27 = arith.mulf %19, %19 : vector<16x128xf32>
    %28 = arith.mulf %4, %4 : vector<16x128xf32>
    %29 = arith.subf %19, %26 : vector<16x128xf32>
    %30 = arith.subf %4, %26 : vector<16x128xf32>
    %31 = arith.addf %29, %30 : vector<16x128xf32>
    %cst_8 = arith.constant -5.000000e-01 : f32
    %32 = vector.broadcast %cst_8 : f32 to vector<16x128xf32>
    %33 = arith.mulf %32, %4 : vector<16x128xf32>
    %cst_9 = arith.constant 7.500000e-01 : f32
    %34 = vector.broadcast %cst_9 : f32 to vector<16x128xf32>
    %35 = arith.addf %34, %33 : vector<16x128xf32>
    %36 = arith.mulf %31, %31 : vector<16x128xf32>
    %37 = arith.mulf %35, %36 : vector<16x128xf32>
    %38 = arith.mulf %37, %25 : vector<16x128xf32>
    %cst_10 = arith.constant 1.000000e+00 : f32
    %39 = vector.broadcast %cst_10 : f32 to vector<8x16xf32>
    %c0_11 = arith.constant 0 : index
    %c0_12 = arith.constant 0 : index
    %c0_13 = arith.constant 0 : index
    %c0_14 = arith.constant 0 : index
    %40 = vector.load %arg4[%c0_11, %c0_12, %c0_13, %c0_14] : memref<1x4x8x128xf32, #tpu.memory_space<vmem>>, vector<1x1x8x128xf32>
    %41 = vector.shape_cast %40 : vector<1x1x8x128xf32> to vector<8x128xf32>
    %cst_15 = arith.constant dense<0.000000e+00> : vector<8x128xf32>
    %42 = tpu.matmul %39, %26, %cst_15 {dimension_numbers = #tpu.dot_dimension_numbers<[1], [0], [0], [1], [0, 0, 1, 1], [], []>} : vector<8x16xf32>, vector<16x128xf32>, vector<8x128xf32> -> vector<8x128xf32>
    %43 = arith.addf %41, %42 : vector<8x128xf32>
    %c0_16 = arith.constant 0 : index
    %c0_17 = arith.constant 0 : index
    %c0_18 = arith.constant 0 : index
    %c0_19 = arith.constant 0 : index
    %44 = vector.load %arg4[%c0_16, %c0_17, %c0_18, %c0_19] : memref<1x4x8x128xf32, #tpu.memory_space<vmem>>, vector<1x1x8x128xf32>
    %45 = vector.shape_cast %44 : vector<1x1x8x128xf32> to vector<8x128xf32>
    %46 = vector.shape_cast %43 : vector<8x128xf32> to vector<1x1x8x128xf32>
    tpu.vector_store %arg4[%c0_16, %c0_17, %c0_18, %c0_19], %46 {strides = array<i32>} : memref<1x4x8x128xf32, #tpu.memory_space<vmem>>, vector<1x1x8x128xf32>,
    %c0_20 = arith.constant 0 : index
    %c1 = arith.constant 1 : index
    %c0_21 = arith.constant 0 : index
    %c0_22 = arith.constant 0 : index
    %47 = vector.load %arg4[%c0_20, %c1, %c0_21, %c0_22] : memref<1x4x8x128xf32, #tpu.memory_space<vmem>>, vector<1x1x8x128xf32>
    %48 = vector.shape_cast %47 : vector<1x1x8x128xf32> to vector<8x128xf32>
    %cst_23 = arith.constant dense<0.000000e+00> : vector<8x128xf32>
    %49 = tpu.matmul %39, %27, %cst_23 {dimension_numbers = #tpu.dot_dimension_numbers<[1], [0], [0], [1], [0, 0, 1, 1], [], []>} : vector<8x16xf32>, vector<16x128xf32>, vector<8x128xf32> -> vector<8x128xf32>
    %50 = arith.addf %48, %49 : vector<8x128xf32>
    %c0_24 = arith.constant 0 : index
    %c1_25 = arith.constant 1 : index
    %c0_26 = arith.constant 0 : index
    %c0_27 = arith.constant 0 : index
    %51 = vector.load %arg4[%c0_24, %c1_25, %c0_26, %c0_27] : memref<1x4x8x128xf32, #tpu.memory_space<vmem>>, vector<1x1x8x128xf32>
    %52 = vector.shape_cast %51 : vector<1x1x8x128xf32> to vector<8x128xf32>
    %53 = vector.shape_cast %50 : vector<8x128xf32> to vector<1x1x8x128xf32>
    tpu.vector_store %arg4[%c0_24, %c1_25, %c0_26, %c0_27], %53 {strides = array<i32>} : memref<1x4x8x128xf32, #tpu.memory_space<vmem>>, vector<1x1x8x128xf32>,
    %c0_28 = arith.constant 0 : index
    %c2 = arith.constant 2 : index
    %c0_29 = arith.constant 0 : index
    %c0_30 = arith.constant 0 : index
    %54 = vector.load %arg4[%c0_28, %c2, %c0_29, %c0_30] : memref<1x4x8x128xf32, #tpu.memory_space<vmem>>, vector<1x1x8x128xf32>
    %55 = vector.shape_cast %54 : vector<1x1x8x128xf32> to vector<8x128xf32>
    %cst_31 = arith.constant dense<0.000000e+00> : vector<8x128xf32>
    %56 = tpu.matmul %39, %28, %cst_31 {dimension_numbers = #tpu.dot_dimension_numbers<[1], [0], [0], [1], [0, 0, 1, 1], [], []>} : vector<8x16xf32>, vector<16x128xf32>, vector<8x128xf32> -> vector<8x128xf32>
    %57 = arith.addf %55, %56 : vector<8x128xf32>
    %c0_32 = arith.constant 0 : index
    %c2_33 = arith.constant 2 : index
    %c0_34 = arith.constant 0 : index
    %c0_35 = arith.constant 0 : index
    %58 = vector.load %arg4[%c0_32, %c2_33, %c0_34, %c0_35] : memref<1x4x8x128xf32, #tpu.memory_space<vmem>>, vector<1x1x8x128xf32>
    %59 = vector.shape_cast %58 : vector<1x1x8x128xf32> to vector<8x128xf32>
    %60 = vector.shape_cast %57 : vector<8x128xf32> to vector<1x1x8x128xf32>
    tpu.vector_store %arg4[%c0_32, %c2_33, %c0_34, %c0_35], %60 {strides = array<i32>} : memref<1x4x8x128xf32, #tpu.memory_space<vmem>>, vector<1x1x8x128xf32>,
    %c0_36 = arith.constant 0 : index
    %c3 = arith.constant 3 : index
    %c0_37 = arith.constant 0 : index
    %c0_38 = arith.constant 0 : index
    %61 = vector.load %arg4[%c0_36, %c3, %c0_37, %c0_38] : memref<1x4x8x128xf32, #tpu.memory_space<vmem>>, vector<1x1x8x128xf32>
    %62 = vector.shape_cast %61 : vector<1x1x8x128xf32> to vector<8x128xf32>
    %cst_39 = arith.constant dense<0.000000e+00> : vector<8x128xf32>
    %63 = tpu.matmul %39, %38, %cst_39 {dimension_numbers = #tpu.dot_dimension_numbers<[1], [0], [0], [1], [0, 0, 1, 1], [], []>} : vector<8x16xf32>, vector<16x128xf32>, vector<8x128xf32> -> vector<8x128xf32>
    %64 = arith.addf %62, %63 : vector<8x128xf32>
    %c0_40 = arith.constant 0 : index
    %c3_41 = arith.constant 3 : index
    %c0_42 = arith.constant 0 : index
    %c0_43 = arith.constant 0 : index
    %65 = vector.load %arg4[%c0_40, %c3_41, %c0_42, %c0_43] : memref<1x4x8x128xf32, #tpu.memory_space<vmem>>, vector<1x1x8x128xf32>
    %66 = vector.shape_cast %65 : vector<1x1x8x128xf32> to vector<8x128xf32>
    %67 = vector.shape_cast %64 : vector<8x128xf32> to vector<1x1x8x128xf32>
    tpu.vector_store %arg4[%c0_40, %c3_41, %c0_42, %c0_43], %67 {strides = array<i32>} : memref<1x4x8x128xf32, #tpu.memory_space<vmem>>, vector<1x1x8x128xf32>,
    return
  }
  func.func @transform_0(%arg0: i32, %arg1: i32) -> (i32, i32) {
    %c1_i32 = arith.constant 1 : i32
    %0 = arith.muli %arg0, %c1_i32 : i32
    %1 = arith.addi %0, %arg1 : i32
    %c0_i32 = arith.constant 0 : i32
    %c0_i32_0 = arith.constant 0 : i32
    return %1, %c0_i32 : i32, i32
  }
  func.func @transform_1(%arg0: i32, %arg1: i32) -> (i32, i32) {
    %c1_i32 = arith.constant 1 : i32
    %0 = arith.muli %arg0, %c1_i32 : i32
    %1 = arith.addi %0, %arg1 : i32
    %c0_i32 = arith.constant 0 : i32
    %c0_i32_0 = arith.constant 0 : i32
    return %1, %c0_i32 : i32, i32
  }
  func.func @transform_2(%arg0: i32, %arg1: i32) -> (i32, i32, i32, i32) {
    %c0_i32 = arith.constant 0 : i32
    %c0_i32_0 = arith.constant 0 : i32
    %c0_i32_1 = arith.constant 0 : i32
    %c0_i32_2 = arith.constant 0 : i32
    return %arg0, %c0_i32, %c0_i32_0, %c0_i32_1 : i32, i32, i32, i32
  }
}

</mosaic_0001>

<bundles_post_ra>
// kernel: tpu_custom_call.1
= control target key start
LH: loop header
LB: loop body
LE: loop exit
PB: predicated region body
PF: predicated region fallthrough
CT: control target
= control target key end

     0   :  { %7 = vsyncpa [#allocation3], 0  ;;  %s441_s0 = inlined_call_operand.hbm [shape: f32[16,128], index: 0, kind: input, shape index: {}]   ;;  %s442_s1 = inlined_call_operand.hbm [shape: f32[16,128], index: 1, kind: input, shape index: {}]   ;;  %s443_s2 = inlined_call_operand.hbm [shape: f32[1,4,8,128], index: 2, kind: output, shape index: {}]  }
   0x1   :  { %8 = vsyncpa [#allocation6], 0 }
   0x2   :  { %9 = vsyncpa [#allocation4], 0  ;;  %s18_s11 = sshll.u32 %s441_s0, 4  ;;  %s360_s12 = smov [#allocation2]   ;;  %s19_s11 = int_to_ptr.hbm [resolvable:$true] %s18_s11 }
   0x3   :  { %s20_s13 = sshll.u32 %s360_s12, 4  ;;  %s35_s16 = sshll.u32 %s442_s1, 4  ;;  %s21_s13 = int_to_ptr.vmem [resolvable:$true] %s20_s13  ;;  %s36_s16 = int_to_ptr.hbm [resolvable:$true] %s35_s16 }
   0x4   :  { %s361_s17 = smov 128   ;;  %s362_s18 = smov 8  }
   0x5   :  { %26 = dma.hbm_to_vmem [thread:$0]  %s19_s11, 256, %s21_s13, [#allocation3], %s361_s17, %s361_s17, %s362_s18  }
   0x6   :  { %s363_s19 = smov [#allocation5]  }
   0x7   :  { %s37_s20 = sshll.u32 %s363_s19, 4  ;;  %s38_s20 = int_to_ptr.vmem [resolvable:$true] %s37_s20 }
   0x8   :  { %43 = dma.hbm_to_vmem [thread:$0]  %s36_s16, 256, %s38_s20, [#allocation6], %s361_s17, %s361_s17, %s362_s18  }
   0x9   :  { %354 = dma.done.wait [#allocation3], 256  }
   0xa   :  { %355 = vsyncadd [#allocation3], 4294967040 }
   0xb   :  { %356 = dma.done.wait [#allocation6], 256  }
   0xc   :  { %357 = vsyncadd [#allocation6], 4294967040  ;;  %v393_v0 = vld [vmem:[#allocation5 + $0x8] sm:$0xff]  ;;  %v65_v1 = vld [vmem:[#allocation2 + $0x8] sm:$0xff]  ;;  %vm141_vm0 = vcmask 130048   ;;  %v364_v16 = vmov 1.0  }
   0xd   :  { %v395_v2 = vld [vmem:[#allocation2] sm:$0xff]  ;;  %v123_v3 = vmul.f32 %v393_v0, %v393_v0  ;;  %v69_v4 = vand.u32 2147483647, %v65_v1  ;;  %v400_v10 = vld [vmem:[#allocation5] sm:$0xff]  ;;  %v93_v24 = vmax.f32 %v65_v1, 0.0  ;;  %v95_v25 = vmul.f32 %v393_v0, %v65_v1  ;;  %s365_s0 = smov [#allocation7]  }
   0xe   :  { %v68_v5 = vand.u32 2147483647, %v395_v2  ;;  %v122_v11 = vmul.f32 %v400_v10, %v400_v10  ;;  %vm87_vm1 = vcmp.ge.f32.partialorder %v65_v1, 0.0  ;;  %vm86_vm2 = vcmp.ge.f32.partialorder %v395_v2, 0.0  ;;  %s243_s1 = sshll.u32 %s365_s0, 4  ;;  %s245_s23 = sshll.u32 %s443_s2, 4  ;;  %s244_s1 = int_to_ptr.vmem [resolvable:$true] %s243_s1  ;;  %s246_s23 = int_to_ptr.hbm [resolvable:$true] %s245_s23 }
   0xf   :  { %207 = vmatpush.msra.mxu2 %v123_v3  ;;  %v71_v6 = vsub.f32 0.0, %v69_v4  ;;  %v97_v35 = vsub.f32 %v93_v24, %v95_v25  ;;  %v131_v36 = vmul.f32 -0.5, %v393_v0  ;;  %v92_v37 = vmax.f32 %v395_v2, 0.0 }
  0x10   :  { %v70_v7 = vsub.f32 0.0, %v68_v5  ;;  %v94_v45 = vmul.f32 %v400_v10, %v395_v2  ;;  %v130_v50 = vmul.f32 -0.5, %v400_v10 }
  0x11   :  { %v74_v8 = vmul.f32 1.442695, %v71_v6  ;;  %208 = vmatpush.msra.mxu2 %v122_v11  ;;  %v133_v56 = vadd.f32 0.75, %v131_v36 }
  0x12   :  { %v72_v9 = vmul.f32 1.442695, %v70_v7  ;;  %261 = vmatmul.msk.f32.vlgmr.msra.gmra.mxu2 %vm141_vm0, %v364_v16  ;;  %v96_v59 = vsub.f32 %v92_v37, %v94_v45  ;;  %v132_v2 = vadd.f32 0.75, %v130_v50 }
  0x13   :  { %270 = vpow2.f32 %v74_v8 }
  0x14   :  { %272 = vpow2.f32 %v72_v9 }
  0x19   :  { %v271_v12 = vpop.eup %270 }
  0x1a   :  { %v273_v13 = vpop.eup %272  ;;  %v77_v14 = vadd.f32 1.0, %v271_v12  ;;  %v110_v19 = vmul.f32 -0.5, %v271_v12  ;;  %v113_v30 = vand.u32 2147483647, %v271_v12 }
  0x1b   :  { %v76_v15 = vadd.f32 1.0, %v273_v13  ;;  %v101_v23 = vmul.f32 -0.5, %v273_v13  ;;  %v104_v38 = vand.u32 2147483647, %v273_v13 }
  0x1c   :  { %274 = vrcp.f32 %v77_v14  ;;  %v111_v27 = vadd.f32 1.0, %v110_v19  ;;  %vm410_vm3 = vcmp.lt.f32.partialorder %v113_v30, 0.0004427343 }
  0x1d   :  { %276 = vrcp.f32 %v76_v15  ;;  %v102_v33 = vadd.f32 1.0, %v101_v23  ;;  %vm419_vm4 = vcmp.lt.f32.partialorder %v104_v38, 0.0004427343 }
  0x1e   :  { %278 = vlog2.f32 %v77_v14  ;;  %v112_v41 = vmul.f32 %v271_v12, %v111_v27 }
  0x1f   :  { %280 = vlog2.f32 %v76_v15  ;;  %v103_v49 = vmul.f32 %v273_v13, %v102_v33 }
  0x22   :  { %v275_v17 = vpop.eup %274 }
  0x23   :  { %v81_v18 = vmul.f32 %v275_v17, %v77_v14  ;;  %v277_v20 = vpop.eup %276 }
  0x24   :  { %v80_v22 = vmul.f32 %v277_v20, %v76_v15  ;;  %v279_v29 = vpop.eup %278 }
  0x25   :  { %v83_v21 = vsub.f32 2.0, %v81_v18  ;;  %v281_v34 = vpop.eup %280  ;;  %v109_v40 = vmul.f32 0.6931472, %v279_v29 }
  0x26   :  { %v82_v28 = vsub.f32 2.0, %v80_v22  ;;  %v100_v48 = vmul.f32 0.6931472, %v281_v34 }
  0x27   :  { %v85_v26 = vmul.f32 %v275_v17, %v83_v21  ;;  %v115_v55 = vsel %vm410_vm3, %v112_v41, %v109_v40 }
  0x28   :  { %v84_v32 = vmul.f32 %v277_v20, %v82_v28  ;;  %v106_v62 = vsel %vm419_vm4, %v103_v49, %v100_v48  ;;  %v117_v63 = vadd.f32 %v115_v55, %v97_v35 }
  0x29   :  { %v89_v31 = vmul.f32 %v271_v12, %v85_v26  ;;  %v116_v4 = vadd.f32 %v106_v62, %v96_v59 }
  0x2a   :  { %v88_v42 = vmul.f32 %v273_v13, %v84_v32 }
  0x2b   :  { %v91_v39 = vsel %vm87_vm1, %v85_v26, %v89_v31 }
  0x2c   :  { %v119_v44 = vmul.f32 %v91_v39, %v393_v0  ;;  %v121_v46 = vmul.f32 %v91_v39, %v91_v39  ;;  %v90_v47 = vsel %vm86_vm2, %v84_v32, %v88_v42 }
  0x2d   :  { %v118_v54 = vmul.f32 %v90_v47, %v400_v10  ;;  %v120_v57 = vmul.f32 %v90_v47, %v90_v47 }
  0x2e   :  { %v125_v51 = vsub.f32 %v91_v39, %v119_v44  ;;  %v127_v52 = vsub.f32 %v393_v0, %v119_v44  ;;  %159 = vmatpush.msra.mxu0 %v119_v44  ;;  %183 = vmatpush.msra.mxu1 %v121_v46 }
  0x2f   :  { %v124_v60 = vsub.f32 %v90_v47, %v118_v54  ;;  %v126_v61 = vsub.f32 %v400_v10, %v118_v54 }
  0x30   :  { %v129_v58 = vadd.f32 %v127_v52, %v125_v51  ;;  %160 = vmatpush.msra.mxu0 %v118_v54  ;;  %184 = vmatpush.msra.mxu1 %v120_v57 }
  0x31   :  { %259 = vmatmul.msk.f32.vlgmr.msra.gmra.mxu0 %vm141_vm0, %v364_v16  ;;  %v128_v1 = vadd.f32 %v126_v61, %v124_v60  ;;  %260 = vmatmul.msk.f32.vlgmr.msra.gmra.mxu1 %vm141_vm0, %v364_v16 }
  0x32   :  { %v135_v0 = vmul.f32 %v129_v58, %v129_v58 }
  0x33   :  { %v134_v5 = vmul.f32 %v128_v1, %v128_v1 }
  0x34   :  { %v137_v3 = vmul.f32 %v135_v0, %v133_v56 }
  0x35   :  { %v136_v7 = vmul.f32 %v134_v5, %v132_v2 }
  0x36   :  { %v139_v6 = vmul.f32 %v137_v3, %v117_v63 }
  0x37   :  { %v138_v8 = vmul.f32 %v136_v7, %v116_v4 }
  0x38   :  { %231 = vmatpush.msra.mxu3 %v139_v6 }
  0x3a   :  { %232 = vmatpush.msra.mxu3 %v138_v8 }
  0x3b   :  { %262 = vmatmul.msk.f32.vlgmr.msra.gmra.mxu3 %vm141_vm0, %v364_v16 }
  0x95   :  { %v210_v9 = vpop.f32.mrf.mxu2 }
  0x96   :  { %214 = vst [vmem:[#allocation7 + $0x10] sm:$0xff] %v210_v9 }
  0xae   :  { %v162_v10 = vpop.f32.mrf.mxu0  ;;  %v186_v11 = vpop.f32.mrf.mxu1 }
  0xaf   :  { %166 = vst [vmem:[#allocation7] sm:$0xff] %v162_v10 }
  0xb0   :  { %190 = vst [vmem:[#allocation7 + $0x8] sm:$0xff] %v186_v11 }
  0xbe   :  { %v234_v12 = vpop.f32.mrf.mxu3 }
  0xbf   :  { %238 = vst [vmem:[#allocation7 + $0x18] sm:$0xff] %v234_v12 }
  0xc0   :  { %251 = dma.vmem_to_hbm [thread:$0]  %s244_s1, 512, %s246_s23, [#allocation4], %s361_s17, %s361_s17, %s362_s18  }
  0xc1   :  { %358 = dma.done.wait [#allocation4], 512  }
  0xc2   :  { %359 = vsyncadd [#allocation4], 4294966784 }
  0xc3   :  { %256 = vsyncpa [#allocation3], 1 }
  0xc4   :  { %257 = vsyncpa [#allocation6], 1 }
  0xc5   :  { %258 = vsyncpa [#allocation4], 1 }

</bundles_post_ra>
